<compile_context>
chip_gen: v7x
topology: tpu7x:2x2x1
jax: 0.10.0
libtpu: 0.0.40
codegen_flags: <defaults>
</compile_context>

<pallas_src>
import math
import functools

import jax
import jax.numpy as jnp
from jax import lax
from jax.experimental import pallas as pl
from jax.experimental.pallas import tpu as pltpu


def _kv_projection_kernel(x_ref, w_ref, o_ref):
    """KV_all = x @ [Wk | Wv]: lane-dense (tk, H*K + H*V) bf16 blocks."""
    o_ref[...] = jnp.dot(x_ref[...], w_ref[...],
                         preferred_element_type=jnp.float32).astype(o_ref.dtype)


def _mha_flash_kernel(xq_ref, kv_ref, wq_ref, wo_ref, out_ref,
                      q_scr, m_scr, l_scr, acc_scr,
                      *, num_heads, k_size, v_size):
    """Flash-style multi-head attention: grid = (q_tiles, kv_tiles)."""
    ki = pl.program_id(1)
    nk = pl.num_programs(1)
    hk = num_heads * k_size
    tq = acc_scr.shape[0]

    @pl.when(ki == 0)
    def _init():
        # Q projection depends only on the q tile -> compute once per qi,
        # cache as bf16 in VMEM scratch and reuse for every kv tile.
        q_scr[...] = jnp.dot(xq_ref[...], wq_ref[...],
                             preferred_element_type=jnp.float32
                             ).astype(jnp.bfloat16)
        m_scr[...] = jnp.full_like(m_scr, -jnp.inf)
        l_scr[...] = jnp.zeros_like(l_scr)
        acc_scr[...] = jnp.zeros_like(acc_scr)

    kv_all = kv_ref[...]                                        # (tk, H*K+H*V) bf16

    pv_parts = []
    alpha_parts = []
    # TODO(synk): head_dim=32 structurally underuses the 256-wide MXU on
    # v6e/v7x; a block-diagonal PV reformulation would fix it but changes the
    # per-head structure of the reference module, so it is not done here.
    for h in range(num_heads):                                  # static unroll (H=4)
        q_h = q_scr[:, h * k_size:(h + 1) * k_size]             # (tq, K) bf16
        k_h = kv_all[:, h * k_size:(h + 1) * k_size]            # (tk, K) bf16
        v_h = kv_all[:, hk + h * v_size: hk + (h + 1) * v_size]   # (tk, V) bf16

        # Scores: contract the last dims directly (same form as the reference
        # flash kernel) — no materialized k.T.
        # NOTE: the reference module applies no 1/sqrt(k_size) scale.
        s = lax.dot_general(q_h, k_h, (((1,), (1,)), ((), ())),
                            preferred_element_type=jnp.float32)  # (tq, tk) f32

        m_prev = m_scr[h]                                       # (tq, 1)
        l_prev = l_scr[h]
        m_new = jnp.maximum(m_prev, jnp.max(s, axis=-1, keepdims=True))
        alpha = jnp.exp(m_prev - m_new)                         # (tq, 1)
        p = jnp.exp(s - m_new)                                  # f32 exp (v5e: no bf16 EUP)
        l_scr[h] = alpha * l_prev + jnp.sum(p, axis=-1, keepdims=True)
        m_scr[h] = m_new

        pv_parts.append(jnp.dot(p.astype(jnp.bfloat16), v_h,
                                preferred_element_type=jnp.float32))  # (tq, V)
        alpha_parts.append(jnp.broadcast_to(alpha, (tq, v_size)))

    # One lane-dense (tq, H*V) accumulator update per grid step instead of
    # per-head 32-lane masked read-modify-writes.
    pv_slab = jnp.concatenate(pv_parts, axis=-1)                # (tq, H*V)
    alpha_slab = jnp.concatenate(alpha_parts, axis=-1)          # (tq, H*V)
    acc_scr[...] = alpha_slab * acc_scr[...] + pv_slab

    @pl.when(ki == nk - 1)
    def _finalize():
        # Build the normalized bf16 operand as a value (no in-place sub-lane
        # RMW) and apply Wo in a single lane-dense matmul.
        inv_slab = jnp.concatenate(
            [jnp.broadcast_to(pl.reciprocal(l_scr[h], approx=True), (tq, v_size))
             for h in range(num_heads)], axis=-1)               # (tq, H*V)
        attn = (acc_scr[...] * inv_slab).astype(jnp.bfloat16)
        out_ref[...] = jnp.dot(attn, wo_ref[...],
                               preferred_element_type=jnp.float32
                               ).astype(out_ref.dtype)


def multi_head_attention(x, wq, wk, wv, wo, *, tq=128, tk=128):
    """x: (S, E) f32; wq/wk: (H, K, E); wv: (H, V, E); wo: (H*V, H*V)
    — all weights in torch's (out_features, in_features) Linear layout."""
    num_heads, k_size, embed = wq.shape
    v_size = wv.shape[1]
    seq = x.shape[0]
    hk = num_heads * k_size
    out_dim = num_heads * v_size
    kv_dim = hk + out_dim

    assert seq % tq == 0 and seq % tk == 0, "seq must be divisible by the tiles"

    # Fused, pre-transposed weights so every projection is `x @ W`:
    #   wq (H, K, E) -> (E, H*K) with column block h == Wq_h^T
    wq_f = jnp.transpose(wq, (2, 0, 1)).reshape(embed, hk)
    wk_f = jnp.transpose(wk, (2, 0, 1)).reshape(embed, hk)
    wv_f = jnp.transpose(wv, (2, 0, 1)).reshape(embed, out_dim)
    wkv_f = jnp.concatenate([wk_f, wv_f], axis=1)               # (E, H*K + H*V)

    # bf16 inputs/weights; f32 accumulation inside the kernels.
    x_b = x.astype(jnp.bfloat16)
    wq_b = wq_f.astype(jnp.bfloat16)
    wkv_b = wkv_f.astype(jnp.bfloat16)
    wo_b = wo.T.astype(jnp.bfloat16)                            # (H*V, H*V)

    # Stage 1: K/V projection — computed exactly once, not once per q tile.
    kv_all = pl.pallas_call(
        _kv_projection_kernel,
        out_shape=jax.ShapeDtypeStruct((seq, kv_dim), jnp.bfloat16),
        grid_spec=pltpu.PrefetchScalarGridSpec(
            num_scalar_prefetch=0,
            grid=(seq // tk,),
            in_specs=[pl.BlockSpec((tk, embed), lambda i: (i, 0)),
                      pl.BlockSpec((embed, kv_dim), lambda i: (0, 0))],
            out_specs=pl.BlockSpec((tk, kv_dim), lambda i: (i, 0)),
        ),
        compiler_params=pltpu.CompilerParams(
            dimension_semantics=("parallel",),
            vmem_limit_bytes=32 * 1024 * 1024),
    )(x_b, wkv_b)

    # Stage 2: flash attention + output projection.
    kernel = functools.partial(_mha_flash_kernel, num_heads=num_heads,
                               k_size=k_size, v_size=v_size)

    return pl.pallas_call(
        kernel,
        out_shape=jax.ShapeDtypeStruct((seq, out_dim), jnp.float32),
        grid_spec=pltpu.PrefetchScalarGridSpec(
            num_scalar_prefetch=0,
            grid=(seq // tq, seq // tk),
            in_specs=[
                pl.BlockSpec((tq, embed), lambda qi, ki: (qi, 0)),    # x for Q
                pl.BlockSpec((tk, kv_dim), lambda qi, ki: (ki, 0)),   # projected K|V
                pl.BlockSpec((embed, hk), lambda qi, ki: (0, 0)),     # Wq fused
                pl.BlockSpec((out_dim, out_dim), lambda qi, ki: (0, 0)),  # Wo^T
            ],
            out_specs=pl.BlockSpec((tq, out_dim), lambda qi, ki: (qi, 0)),
            scratch_shapes=[
                pltpu.VMEM((tq, hk), jnp.bfloat16),            # cached Q projection
                pltpu.VMEM((num_heads, tq, 1), jnp.float32),   # running max m
                pltpu.VMEM((num_heads, tq, 1), jnp.float32),   # running sum l
                pltpu.VMEM((tq, out_dim), jnp.float32),        # per-head acc slab
            ],
        ),
        compiler_params=pltpu.CompilerParams(
            dimension_semantics=("parallel", "arbitrary"),
            vmem_limit_bytes=32 * 1024 * 1024),
    )(x_b, kv_all, wq_b, wo_b)


def _reference(x, wq, wk, wv, wo):
    """Pure-JAX mirror of the torch forward (A1 branch), with the same bf16
    operand quantization / f32 accumulation the kernel uses."""
    bf, f32 = jnp.bfloat16, jnp.float32
    xb = x.astype(bf).astype(f32)
    outs = []
    for h in range(wq.shape[0]):
        wqh = wq[h].astype(bf).astype(f32)
        wkh = wk[h].astype(bf).astype(f32)
        wvh = wv[h].astype(bf).astype(f32)
        q = (xb @ wqh.T).astype(bf).astype(f32)
        k = (xb @ wkh.T).astype(bf).astype(f32)
        v = (xb @ wvh.T).astype(bf).astype(f32)
        s = q @ k.T                       # module applies no 1/sqrt(k) scale
        w = jax.nn.softmax(s, axis=-1).astype(bf).astype(f32)
        outs.append(w @ v)
    a1 = jnp.concatenate(outs, axis=-1).astype(bf).astype(f32)
    return a1 @ wo.astype(bf).astype(f32).T


def _uniform_linear_weight(key, out_features, in_features):
    """Deterministic stand-in for torch.nn.Linear default init (±1/sqrt(in))."""
    bound = 1.0 / math.sqrt(in_features)
    return jax.random.uniform(key, (out_features, in_features),
                              minval=-bound, maxval=bound, dtype=jnp.float32)


if __name__ == "__main__":
    # Small shapes: H*K = H*V = 128 (lane-dense), grid (2, 2) -> even q axis.
    seq = 256
    embed_size = 128
    k_size = 32
    v_size = 32
    num_heads = 4

    root = jax.random.PRNGKey(0)
    keys = jax.random.split(root, 1 + 3 * num_heads + 1)
    x = jax.random.normal(keys[0], (seq, embed_size), dtype=jnp.float32)

    # Per-head weights, stacked exactly like MultiHeadAttention.__init__ copies them.
    wq = jnp.stack([_uniform_linear_weight(keys[1 + 3 * h + 0], k_size, embed_size)
                    for h in range(num_heads)])          # (H, K, E)
    wk = jnp.stack([_uniform_linear_weight(keys[1 + 3 * h + 1], k_size, embed_size)
                    for h in range(num_heads)])          # (H, K, E)
    wv = jnp.stack([_uniform_linear_weight(keys[1 + 3 * h + 2], v_size, embed_size)
                    for h in range(num_heads)])          # (H, V, E)
    wo = _uniform_linear_weight(keys[-1], v_size * num_heads, v_size * num_heads)

    out = multi_head_attention(x, wq, wk, wv, wo)
    out = jax.block_until_ready(out)

    ref = _reference(x, wq, wk, wv, wo)
    assert out.shape == (seq, num_heads * v_size)
    assert jnp.allclose(out, ref, atol=2e-2, rtol=2e-2), "mismatch vs JAX reference"

    print("KERNEL_OK")
</pallas_src>

<mosaic_0001>
module attributes {stable_mosaic.version = 11 : i64} {
  func.func @_kv_projection_kernel(%arg0: i32, %arg1: memref<128x128xbf16, #tpu.memory_space<vmem>>, %arg2: memref<128x256xbf16, #tpu.memory_space<vmem>>, %arg3: memref<128x256xbf16, #tpu.memory_space<vmem>>) attributes {dimension_semantics = [#tpu.dimension_semantics<parallel>], iteration_bounds = array<i64: 2>, scalar_prefetch = 0 : i64, scratch_operands = 0 : i64, tpu.core_type = #tpu.core_type<tc>, window_params = [{transform_indices = @transform_0, window_bounds = array<i64: 128, 128>}, {pipeline_mode = #tpu.pipeline_mode<synchronous>, transform_indices = @transform_1, window_bounds = array<i64: 128, 256>}, {transform_indices = @transform_2, window_bounds = array<i64: 128, 256>}]} {
    %c0 = arith.constant 0 : index
    %c0_0 = arith.constant 0 : index
    %0 = vector.load %arg1[%c0, %c0_0] : memref<128x128xbf16, #tpu.memory_space<vmem>>, vector<128x128xbf16>
    %c0_1 = arith.constant 0 : index
    %c0_2 = arith.constant 0 : index
    %1 = vector.load %arg2[%c0_1, %c0_2] : memref<128x256xbf16, #tpu.memory_space<vmem>>, vector<128x256xbf16>
    %cst = arith.constant dense<0.000000e+00> : vector<128x256xf32>
    %2 = tpu.matmul %0, %1, %cst {dimension_numbers = #tpu.dot_dimension_numbers<[1], [0], [0], [1], [0, 0, 1, 1], [], []>} : vector<128x128xbf16>, vector<128x256xbf16>, vector<128x256xf32> -> vector<128x256xf32>
    %3 = arith.truncf %2 : vector<128x256xf32> to vector<128x256xbf16>
    %c0_3 = arith.constant 0 : index
    %c0_4 = arith.constant 0 : index
    %4 = vector.load %arg3[%c0_3, %c0_4] : memref<128x256xbf16, #tpu.memory_space<vmem>>, vector<128x256xbf16>
    tpu.vector_store %arg3[%c0_3, %c0_4], %3 {strides = array<i32>} : memref<128x256xbf16, #tpu.memory_space<vmem>>, vector<128x256xbf16>,
    return
  }
  func.func @transform_0(%arg0: i32) -> (i32, i32) {
    %c0_i32 = arith.constant 0 : i32
    %c0_i32_0 = arith.constant 0 : i32
    return %arg0, %c0_i32 : i32, i32
  }
  func.func @transform_1(%arg0: i32) -> (i32, i32) {
    %c0_i32 = arith.constant 0 : i32
    %c0_i32_0 = arith.constant 0 : i32
    %c0_i32_1 = arith.constant 0 : i32
    return %c0_i32, %c0_i32_0 : i32, i32
  }
  func.func @transform_2(%arg0: i32) -> (i32, i32) {
    %c0_i32 = arith.constant 0 : i32
    %c0_i32_0 = arith.constant 0 : i32
    return %arg0, %c0_i32 : i32, i32
  }
}

</mosaic_0001>

<bundles_post_ra>
// kernel: tpu_custom_call.1
= control target key start
LH: loop header
LB: loop body
LE: loop exit
PB: predicated region body
PF: predicated region fallthrough
CT: control target
= control target key end

     0   :  { %7 = vsyncpa [#allocation3], 0  ;;  %s1245_s0 = inlined_call_operand.hbm [shape: bf16[256,128], index: 0, kind: input, shape index: {}]   ;;  %s1246_s1 = inlined_call_operand.hbm [shape: bf16[128,256], index: 1, kind: input, shape index: {}]   ;;  %s1247_s2 = inlined_call_operand.hbm [shape: bf16[256,256], index: 2, kind: output, shape index: {}]  }
   0x1   :  { %9 = vsyncpa [#allocation3 + $0x1], 0 }
   0x2   :  { %10 = vsyncpa [#allocation6], 0 }
   0x3   :  { %11 = vsyncpa [#allocation4], 0 }
   0x4   :  { %13 = vsyncpa [#allocation4 + $0x1], 0  ;;  %s1006_s9 = smov 0   ;;  %s1008_s10 = smov 0  }
   0x5   :  { %s1010_s11 = smov 0   ;;  %s1012_s12 = smov 0  }
   0x6 LB: > { %s1027_s13 = sadd.s32 4294967295, %s979_s12   ;;  %s663_s14 = sadd.s32 4294967294, %s979_s12   ;;  %s979_s12 = sphi %s1012_s12, %s1267_s12   ;;  %s975_s11 = sphi %s1010_s11, %s1266_s11   ;;  %s971_s10 = sphi %s1008_s10, %s1265_s10   ;;  %s967_s9 = sphi %s1006_s9, %s1264_s9  }
   0x7   : > { %p39_p0 = scmp.ne.s32.totalorder %s971_s10, %s967_s9  ;;  %p1248_p1 = scmp.eq.s32.totalorder %s1027_s13, 0 }
   0x8   : > { %p90_p3 = scmp.eq.s32.totalorder %s663_s14, 1  ;;  %p664_p5 = scmp.ge.s32.totalorder %s979_s12, 1 }
   0x9   : > { %p1036_p4 = por %p1248_p1, %p39_p0  ;;  %p97_p7 = scmp.lt.s32.totalorder %s979_s12, 3 }
   0xa   : > { %p1041_p6 = por %p90_p3, %p39_p0  ;;  %s981_s18 = smov [#allocation5]  }
   0xb   : > { %s1251_s15 = scalar_select %p1036_p4, 1, 0 }
   0xc   : > { %s1252_s16 = scalar_select %p1041_p6, 1, 0 }
   0xd   : > { %p1046_p8 = pnand %p664_p5, %p97_p7  ;;  %s109_s19 = sshll.u32 %s981_s18, 4  ;;  %s1050_s19 = int_to_ptr.vmem [resolvable:$true] %s109_s19 }
   0xe   : > { %s1062_s21 = sadd.s32 1, %s979_s12   ;;  %s26_s22 = sadd.s32 1, %s975_s11 }
   0xf   : > { %s1253_s17 = scalar_select %p1046_p8, 1, 0 }
  0x10   : > { %p763_p9 = pneg %p1046_p8  ;;  %s23_s23 = ssub.s32 %s979_s12, %s1062_s21 }
  0x11   : > { %s851_s26 = scalar_lea.hbm %s1246_s1, 2048 }
  0x12   : > { %p1057_p11 = pnand %p763_p9, %p1248_p1  ;;  %p852_p12 = scmp.ne.s32.totalorder %s1246_s1, %s851_s26 }
  0x13   : > { %p858_p5 = scmp.lt.u32.totalorder %s851_s26, %s1246_s1 }
  0x14   : > { %p853_p13 = pneg %p1057_p11 }
  0x16   : > { %p854_p0 = pnand %p853_p13, %p852_p12 }
  0x18   : > { %p855_p3 = pneg %p854_p0 }
  0x1a   : > { %p860_p7 = pnand %p858_p5, %p855_p3 }
  0x1c   : > { %863 = shalt.err (!%p860_p7)
}
  0x1d   : > { %s864_s3 = scalar_lea.vmem %s1050_s19, 2048  ;;  %p872_p2 = scmp.lt.s32.totalorder %s1050_s19, %s1050_s19 }
  0x1e   : > { %p865_p9 = scmp.ne.s32.totalorder %s1050_s19, %s864_s3  ;;  %p873_p6 = scmp.lt.s32.totalorder %s864_s3, %s864_s3 }
  0x20   : > { %p867_p10 = pnand %p865_p9, %p853_p13  ;;  %p874_p4 = por %p873_p6, %p872_p2 }
  0x22   : > { %p868_p1 = pneg %p867_p10 }
  0x24   : > { %p875_p8 = pnand %p874_p4, %p868_p1 }
  0x26   : > { %878 = shalt.err (!%p875_p8)
}
  0x27   : > { %s982_s4 = smov 128   ;;  %s983_s5 = smov 8  }
  0x28   : > { %766 = dma.hbm_to_vmem [thread:$0]  (!%p1057_p11), %s1246_s1, 2048, %s1050_s19, [#allocation6], %s982_s4, %s982_s4, %s983_s5  }
  0x29   : > { %p24_p2 = scmp.eq.s32.totalorder %s23_s23, 0  ;;  %p33_p1 = scmp.ne.s32.totalorder %s975_s11, %s971_s10 }
  0x2a   : > { %p34_p4 = scmp.eq.s32.totalorder %s979_s12, 0  ;;  %p776_p6 = scmp.lt.s32.totalorder %s979_s12, 2 }
  0x2b   : > { %s1093_s8 = scalar_select %p24_p2, %s975_s11, %s26_s22  }
  0x2c   : > { %p35_p8 = por %p34_p4, %p33_p1  ;;  %p1255_p10 = scmp.eq.s32.totalorder %s1027_s13, 1 }
  0x2d   : > { %s123_s18 = sand.u32 1, %s975_s11   ;;  %s720_s24 = sshll.u32 %s979_s12, 10 }
  0x2e   : > { %p1097_p12 = por %p1255_p10, %p33_p1  ;;  %s667_s25 = sshll.u32 %s123_s18, 6 }
  0x2f   : > { %s1106_s27 = scalar_lea.hbm %s1245_s0, %s720_s24  ;;  %s127_s19 = scalar_lea.vmem [#allocation2], %s667_s25 }
  0x30   : > { %s134_s22 = sshll.u32 %s127_s19, 4  ;;  %p1108_p11 = pnand %p776_p6, %p35_p8  ;;  %s1112_s22 = int_to_ptr.vmem [resolvable:$true] %s134_s22 }
  0x31   : > { %s1114_s28 = scalar_lea.sflag [#allocation3], %s123_s18  ;;  %s879_s29 = scalar_lea.hbm %s1106_s27, 1024 }
  0x32   : > { %p880_p13 = scmp.ne.s32.totalorder %s1106_s27, %s879_s29  ;;  %p881_p0 = pneg %p1108_p11 }
  0x33   : > { %s884_s4 = scalar_lea.hbm %s1245_s0, 2048  ;;  %p885_p7 = scmp.lt.u32.totalorder %s1106_s27, %s1245_s0 }
  0x34   : > { %p882_p3 = pnand %p881_p0, %p880_p13  ;;  %p886_p9 = scmp.lt.u32.totalorder %s884_s4, %s879_s29 }
  0x35   : > { %p888_p1 = scmp.lt.u32.totalorder %s879_s29, %s1106_s27 }
  0x36   : > { %p883_p5 = pneg %p882_p3  ;;  %p887_p2 = por %p886_p9, %p885_p7 }
  0x38   : > { %p889_p4 = por %p888_p1, %p887_p2 }
  0x3a   : > { %p890_p6 = pnand %p889_p4, %p883_p5 }
  0x3c   : > { %893 = shalt.err (!%p890_p6)
}
  0x3d   : > { %s894_s7 = scalar_lea.vmem %s1112_s22, 1024  ;;  %s984_s18 = smov [#allocation2]  }
  0x3e   : > { %p895_p8 = scmp.ne.s32.totalorder %s1112_s22, %s894_s7  ;;  %s899_s24 = sshll.u32 %s984_s18, 4  ;;  %s900_s24 = int_to_ptr.vmem [resolvable:$false] %s899_s24 }
  0x3f   : > { %s901_s25 = scalar_lea.vmem %s900_s24, 2048  ;;  %p902_p3 = scmp.lt.s32.totalorder %s1112_s22, %s900_s24 }
  0x40   : > { %p897_p10 = pnand %p895_p8, %p881_p0  ;;  %p903_p7 = scmp.lt.s32.totalorder %s901_s25, %s894_s7 }
  0x42   : > { %p898_p13 = pneg %p897_p10  ;;  %p904_p9 = por %p903_p7, %p902_p3 }
  0x44   : > { %p905_p2 = pnand %p904_p9, %p898_p13 }
  0x46   : > { %908 = shalt.err (!%p905_p2)
}
  0x47   : > { %s985_s20 = smov 64   ;;  %s986_s26 = smov 4  }
  0x48   : > { %770 = dma.hbm_to_vmem [thread:$0]  (!%p1108_p11), %s1106_s27, 1024, %s1112_s22, %s1114_s28, %s985_s20, %s985_s20, %s986_s26  }
  0x49   : > { %p1258_p0 = scmp.ne.s32.totalorder %s1253_s17, 0 }
  0x4a   : > { %s1145_s19 = sand.u32 (!%p1258_p0), 1, %s971_s10   ;;  %p1259_p5 = scmp.ne.s32.totalorder (!%p1258_p0), %s1251_s15, 0 }
  0x4b   : > { %146 = sbr.rel (%p1258_p0) target bundleno = 376 (0x178), region = 28  ;;  %s671_s29 = sshll.u32 (!%p1258_p0), %s1145_s19, 6 }
  0x4c   : > { %s149_s30 = scalar_lea.sflag (!%p1258_p0), [#allocation3], %s1145_s19  ;;  %s1149_s3 = scalar_lea.vmem (!%p1258_p0), [#allocation2], %s671_s29 }
  0x52   : > { %954 = dma.done.wait (%p1259_p5), %s149_s30, 1024  }
  0x53   : > { %956 = vsyncadd (%p1259_p5), %s149_s30, 4294966272  ;;  %p1260_p11 = scmp.eq.s32.totalorder %s1027_s13, 0 }
  0x55   : > { %958 = dma.done.wait (%p1260_p11), [#allocation6], 2048   ;;  %p1261_p1 = pmov %p1260_p11 }
  0x56   : > { %v987_v0 = vmov 0   ;;  %v819_v1 = vld [vmem:[#allocation5 + $0x4] ss:$8 sps:$4 sm:$0xff]   ;;  %v821_v2 = vld [vmem:[#allocation5] ss:$8 sps:$4 sm:$0xff]   ;;  %v847_v21 = vld [vmem:[%s1149_s3 + $0x10] sm:$0xff]  }
  0x57   : > { %960 = vsyncadd (%p1261_p1), [#allocation6], 4294965248  ;;  %372 = vmatprep.mubr.bf16.mxu0 %v987_v0  ;;  %412 = vmatprep.mubr.bf16.mxu1 %v987_v0  ;;  %v822_v3 = vld [vmem:[#allocation5 + $0x14] ss:$8 sps:$4 sm:$0xff]   ;;  %v824_v4 = vld [vmem:[#allocation5 + $0x10] ss:$8 sps:$4 sm:$0xff]  }
  0x58   : > { %340 = vmatprep.subr.bf16.mxu0 %v819_v1  ;;  %739 = vmatprep.subr.bf16.mxu1 %v819_v1  ;;  %v825_v5 = vld [vmem:[#allocation5 + $0x24] ss:$8 sps:$4 sm:$0xff]   ;;  %v827_v6 = vld [vmem:[#allocation5 + $0x20] ss:$8 sps:$4 sm:$0xff]   ;;  %v828_v7 = vld [vmem:[#allocation5 + $0x34] ss:$8 sps:$4 sm:$0xff]  }
  0x59   : > { %341 = vmatpush1.bf16.msra.mxu0 %v821_v2  ;;  %747 = vmatpush1.bf16.msra.mxu1 %v821_v2  ;;  %v830_v8 = vld [vmem:[#allocation5 + $0x30] ss:$8 sps:$4 sm:$0xff]   ;;  %v831_v9 = vld [vmem:[#allocation5 + $0x44] ss:$8 sps:$4 sm:$0xff]   ;;  %v833_v10 = vld [vmem:[#allocation5 + $0x40] ss:$8 sps:$4 sm:$0xff]  }
  0x5a   : > { %342 = vmatprep.subr.bf16.mxu0 %v822_v3  ;;  %740 = vmatprep.subr.bf16.mxu1 %v822_v3  ;;  %v834_v11 = vld [vmem:[#allocation5 + $0x54] ss:$8 sps:$4 sm:$0xff]   ;;  %v836_v12 = vld [vmem:[#allocation5 + $0x50] ss:$8 sps:$4 sm:$0xff]   ;;  %v837_v13 = vld [vmem:[#allocation5 + $0x64] ss:$8 sps:$4 sm:$0xff]  }
  0x5b   : > { %v839_v14 = vld [vmem:[#allocation5 + $0x60] ss:$8 sps:$4 sm:$0xff]   ;;  %v840_v15 = vld [vmem:[#allocation5 + $0x74] ss:$8 sps:$4 sm:$0xff]   ;;  %v842_v16 = vld [vmem:[#allocation5 + $0x70] ss:$8 sps:$4 sm:$0xff]  }
  0x5c   : > { %v843_v17 = vld [vmem:[%s1149_s3] sm:$0xff]   ;;  %v845_v19 = vld [vmem:[%s1149_s3 + $0x8] sm:$0xff]   ;;  %v848_v22 = vld [vmem:[%s1149_s3 + $0x30] sm:$0xff]   ;;  %s673_s15 = sshll.u32 %s1145_s19, 7  ;;  %s738_s27 = sshll.u32 %s1027_s13, 11 }
  0x5d   : > { %343 = vmatpush1.bf16.msra.mxu0 %v824_v4  ;;  %748 = vmatpush1.bf16.msra.mxu1 %v824_v4  ;;  %v844_v18 = vld [vmem:[%s1149_s3 + $0x20] sm:$0xff]   ;;  %v846_v20 = vld [vmem:[%s1149_s3 + $0x28] sm:$0xff]   ;;  %v849_v23 = vld [vmem:[%s1149_s3 + $0x18] sm:$0xff]   ;;  %s1176_s17 = scalar_lea.vmem [#allocation7], %s673_s15  ;;  %s1195_s4 = scalar_lea.hbm %s1247_s2, %s738_s27 }
  0x5e   : > { %344 = vmatprep.subr.bf16.mxu0 %v825_v5  ;;  %741 = vmatprep.subr.bf16.mxu1 %v825_v5  ;;  %v850_v24 = vld [vmem:[%s1149_s3 + $0x38] sm:$0xff]   ;;  %s580_s22 = sshll.u32 %s1176_s17, 4  ;;  %s566_s13 = scalar_lea.sflag [#allocation4], %s1145_s19  ;;  %s1197_s22 = int_to_ptr.vmem [resolvable:$true] %s580_s22 }
  0x5f   : > { %s909_s5 = scalar_lea.vmem %s1197_s22, 2048  ;;  %s988_s6 = smov [#allocation7]  }
  0x60   : > { %p910_p4 = scmp.ne.s32.totalorder %s1197_s22, %s909_s5  ;;  %s913_s7 = sshll.u32 %s988_s6, 4  ;;  %s914_s7 = int_to_ptr.vmem [resolvable:$false] %s913_s7 }
  0x61   : > { %345 = vmatpush1.bf16.msra.mxu0 %v827_v6  ;;  %749 = vmatpush1.bf16.msra.mxu1 %v827_v6  ;;  %s915_s18 = scalar_lea.vmem %s914_s7, 4096  ;;  %p916_p10 = scmp.lt.s32.totalorder %s1197_s22, %s914_s7 }
  0x62   : > { %346 = vmatprep.subr.bf16.mxu0 %v828_v7  ;;  %742 = vmatprep.subr.bf16.mxu1 %v828_v7  ;;  %p911_p6 = pnand %p910_p4, %p1097_p12  ;;  %p917_p13 = scmp.lt.s32.totalorder %s915_s18, %s909_s5 }
  0x64   : > { %p912_p8 = pneg %p911_p6  ;;  %p918_p3 = por %p917_p13, %p916_p10 }
  0x65   : > { %347 = vmatpush1.bf16.msra.mxu0 %v830_v8  ;;  %750 = vmatpush1.bf16.msra.mxu1 %v830_v8 }
  0x66   : > { %348 = vmatprep.subr.bf16.mxu0 %v831_v9  ;;  %743 = vmatprep.subr.bf16.mxu1 %v831_v9  ;;  %p919_p7 = pnand %p918_p3, %p912_p8 }
  0x69   : > { %349 = vmatpush1.bf16.msra.mxu0 %v833_v10  ;;  %751 = vmatpush1.bf16.msra.mxu1 %v833_v10 }
  0x6a   : > { %350 = vmatprep.subr.bf16.mxu0 %v834_v11  ;;  %744 = vmatprep.subr.bf16.mxu1 %v834_v11 }
  0x6d   : > { %351 = vmatpush1.bf16.msra.mxu0 %v836_v12  ;;  %752 = vmatpush1.bf16.msra.mxu1 %v836_v12 }
  0x6e   : > { %352 = vmatprep.subr.bf16.mxu0 %v837_v13  ;;  %745 = vmatprep.subr.bf16.mxu1 %v837_v13 }
  0x71   : > { %353 = vmatpush1.bf16.msra.mxu0 %v839_v14  ;;  %753 = vmatpush1.bf16.msra.mxu1 %v839_v14 }
  0x72   : > { %354 = vmatprep.subr.bf16.mxu0 %v840_v15  ;;  %746 = vmatprep.subr.bf16.mxu1 %v840_v15 }
  0x75   : > { %355 = vmatpush1.bf16.msra.mxu0 %v842_v16  ;;  %754 = vmatpush1.bf16.msra.mxu1 %v842_v16 }
  0x78   : > { %373 = vmatmul.mubr.bf16.vlgmr.msra.gmra.mrb[0].mxu0 %v843_v17  ;;  %413 = vmatmul.mubr.bf16.vlgmr.msra.gmra.mrb[0].mxu1 %v844_v18 }
  0x79   : > { %382 = vmatprep.mubr.bf16.mxu0 %v987_v0  ;;  %422 = vmatprep.mubr.bf16.mxu1 %v987_v0 }
  0x80   : > { %383 = vmatmul.mubr.bf16.gmra.mrb[4].mxu0 %v845_v19  ;;  %423 = vmatmul.mubr.bf16.gmra.mrb[4].mxu1 %v846_v20 }
  0x81   : > { %392 = vmatprep.mubr.bf16.mxu0 %v987_v0  ;;  %432 = vmatprep.mubr.bf16.mxu1 %v987_v0 }
  0x88   : > { %393 = vmatmul.mubr.bf16.gmra.mrb[8].mxu0 %v847_v21  ;;  %433 = vmatmul.mubr.bf16.gmra.mrb[8].mxu1 %v848_v22 }
  0x89   : > { %402 = vmatprep.mubr.bf16.mxu0 %v987_v0  ;;  %442 = vmatprep.mubr.bf16.mxu1 %v987_v0 }
  0x90   : > { %403 = vmatmul.mubr.bf16.gmra.mrb[12].mxu0 %v849_v23  ;;  %443 = vmatmul.mubr.bf16.gmra.mrb[12].mxu1 %v850_v24 }
 0x14b   : > { %v374_v25 = vpop.f32.mrb[0].mxu0  ;;  %v414_v26 = vpop.f32.mrb[0].mxu1 }
 0x14c   : > { %v376_v27 = vpop.f32.mrb[1].mxu0  ;;  %v416_v28 = vpop.f32.mrb[1].mxu1 }
 0x14d   : > { %v721_v29 = vpack.c.bf16 %v376_v27, %v374_v25  ;;  %v729_v30 = vpack.c.bf16 %v416_v28, %v414_v26  ;;  %v378_v31 = vpop.f32.mrb[2].mxu0  ;;  %v418_v32 = vpop.f32.mrb[2].mxu1 }
 0x14e   : > { %v380_v33 = vpop.f32.mrb[3].mxu0  ;;  %v420_v34 = vpop.f32.mrb[3].mxu1 }
 0x14f   : > { %549 = vst [vmem:[%s1176_s17] sm:$0xff] %v721_v29  ;;  %557 = vst [vmem:[%s1176_s17 + $0x40] sm:$0xff] %v729_v30  ;;  %v722_v35 = vpack.c.bf16 %v380_v33, %v378_v31  ;;  %v730_v36 = vpack.c.bf16 %v420_v34, %v418_v32 }
 0x151   : > { %550 = vst [vmem:[%s1176_s17 + $0x8] sm:$0xff] %v722_v35  ;;  %558 = vst [vmem:[%s1176_s17 + $0x48] sm:$0xff] %v730_v36 }
 0x153   : > { %v384_v37 = vpop.f32.mrb[4].mxu0  ;;  %v424_v38 = vpop.f32.mrb[4].mxu1 }
 0x154   : > { %v386_v39 = vpop.f32.mrb[5].mxu0  ;;  %v426_v40 = vpop.f32.mrb[5].mxu1 }
 0x155   : > { %v723_v41 = vpack.c.bf16 %v386_v39, %v384_v37  ;;  %v731_v42 = vpack.c.bf16 %v426_v40, %v424_v38  ;;  %v388_v43 = vpop.f32.mrb[6].mxu0  ;;  %v428_v44 = vpop.f32.mrb[6].mxu1 }
 0x156   : > { %v390_v45 = vpop.f32.mrb[7].mxu0  ;;  %v430_v46 = vpop.f32.mrb[7].mxu1 }
 0x157   : > { %551 = vst [vmem:[%s1176_s17 + $0x10] sm:$0xff] %v723_v41  ;;  %559 = vst [vmem:[%s1176_s17 + $0x50] sm:$0xff] %v731_v42  ;;  %v724_v47 = vpack.c.bf16 %v390_v45, %v388_v43  ;;  %v732_v48 = vpack.c.bf16 %v430_v46, %v428_v44 }
 0x159   : > { %552 = vst [vmem:[%s1176_s17 + $0x18] sm:$0xff] %v724_v47  ;;  %560 = vst [vmem:[%s1176_s17 + $0x58] sm:$0xff] %v732_v48 }
 0x15b   : > { %v394_v49 = vpop.f32.mrb[8].mxu0  ;;  %v434_v50 = vpop.f32.mrb[8].mxu1 }
 0x15c   : > { %v396_v51 = vpop.f32.mrb[9].mxu0  ;;  %v436_v52 = vpop.f32.mrb[9].mxu1 }
 0x15d   : > { %v725_v53 = vpack.c.bf16 %v396_v51, %v394_v49  ;;  %v733_v54 = vpack.c.bf16 %v436_v52, %v434_v50  ;;  %v398_v55 = vpop.f32.mrb[10].mxu0  ;;  %v438_v56 = vpop.f32.mrb[10].mxu1 }
 0x15e   : > { %v400_v57 = vpop.f32.mrb[11].mxu0  ;;  %v440_v58 = vpop.f32.mrb[11].mxu1 }
 0x15f   : > { %553 = vst [vmem:[%s1176_s17 + $0x20] sm:$0xff] %v725_v53  ;;  %561 = vst [vmem:[%s1176_s17 + $0x60] sm:$0xff] %v733_v54  ;;  %v726_v59 = vpack.c.bf16 %v400_v57, %v398_v55  ;;  %v734_v60 = vpack.c.bf16 %v440_v58, %v438_v56 }
 0x161   : > { %554 = vst [vmem:[%s1176_s17 + $0x28] sm:$0xff] %v726_v59  ;;  %562 = vst [vmem:[%s1176_s17 + $0x68] sm:$0xff] %v734_v60 }
 0x163   : > { %v404_v61 = vpop.f32.mrb[12].mxu0  ;;  %v444_v62 = vpop.f32.mrb[12].mxu1 }
 0x164   : > { %v406_v63 = vpop.f32.mrb[13].mxu0  ;;  %v446_v0 = vpop.f32.mrb[13].mxu1 }
 0x165   : > { %v727_v1 = vpack.c.bf16 %v406_v63, %v404_v61  ;;  %v735_v2 = vpack.c.bf16 %v446_v0, %v444_v62  ;;  %v408_v3 = vpop.f32.mrb[14].mxu0  ;;  %v448_v4 = vpop.f32.mrb[14].mxu1 }
 0x166   : > { %v410_v5 = vpop.f32.mrb[15].mxu0  ;;  %v450_v6 = vpop.f32.mrb[15].mxu1 }
 0x167   : > { %555 = vst [vmem:[%s1176_s17 + $0x30] sm:$0xff] %v727_v1  ;;  %563 = vst [vmem:[%s1176_s17 + $0x70] sm:$0xff] %v735_v2  ;;  %v728_v7 = vpack.c.bf16 %v410_v5, %v408_v3  ;;  %v736_v8 = vpack.c.bf16 %v450_v6, %v448_v4 }
 0x169   : > { %556 = vst [vmem:[%s1176_s17 + $0x38] sm:$0xff] %v728_v7  ;;  %564 = vst [vmem:[%s1176_s17 + $0x78] sm:$0xff] %v736_v8 }
 0x16a   : > { %922 = shalt.err (!%p919_p7)
}
 0x16b   : > { %s923_s24 = scalar_lea.hbm %s1195_s4, 2048  ;;  %s927_s26 = scalar_lea.hbm %s1247_s2, 4096 }
 0x16c   : > { %p924_p9 = scmp.ne.s32.totalorder %s1195_s4, %s923_s24  ;;  %p928_p5 = scmp.lt.u32.totalorder %s1195_s4, %s1247_s2 }
 0x16d   : > { %p929_p11 = scmp.lt.u32.totalorder %s927_s26, %s923_s24  ;;  %p931_p4 = scmp.lt.u32.totalorder %s923_s24, %s1195_s4 }
 0x16e   : > { %p925_p2 = pnand %p924_p9, %p1097_p12 }
 0x16f   : > { %p930_p1 = por %p929_p11, %p928_p5 }
 0x170   : > { %p926_p0 = pneg %p925_p2 }
 0x171   : > { %p932_p6 = por %p931_p4, %p930_p1 }
 0x173   : > { %p933_p8 = pnand %p932_p6, %p926_p0 }
 0x175   : > { %936 = shalt.err (!%p933_p8)
}
 0x176   : > { %s989_s3 = smov 128   ;;  %s990_s15 = smov 8  }
 0x177   : > { %761 = dma.vmem_to_hbm [thread:$0]  (%p1097_p12), %s1197_s22, 2048, %s1195_s4, %s566_s13, %s989_s3, %s989_s3, %s990_s15  }
 0x178 PF: > { %s595_s17 = sand.u32 1, %s967_s9   ;;  %p1262_p10 = scmp.ne.s32.totalorder %s1252_s16, 0 }
 0x179   : > { %p1263_p13 = scmp.ge.s32.totalorder %s979_s12, 2  ;;  %s596_s27 = scalar_lea.sflag [#allocation4], %s595_s17 }
 0x17b   : > { %p772_p3 = pnand %p1263_p13, %p1262_p10 }
 0x17d   : > { %962 = dma.done.wait (!%p772_p3), %s596_s27, 2048  }
 0x17e   : > { %964 = vsyncadd (!%p772_p3), %s596_s27, 4294965248  ;;  %p16_p7 = scmp.ge.s32.totalorder %s1062_s21, 4   ;;  %s1264_s9 = smov %s971_s10 }
 0x17f   : > { %s1265_s10 = smov %s975_s11  ;;  %s1266_s11 = smov %s1093_s8 }
 0x180   : > { %s1267_s12 = smov %s1062_s21  ;;  %18 = sbr.rel (!%p16_p7) target bundleno = 6 (0x6), region = 77 }
 0x187   :  { %601 = vsyncpa [#allocation3], 1 }
 0x188   :  { %603 = vsyncpa [#allocation3 + $0x1], 1 }
 0x189   :  { %604 = vsyncpa [#allocation6], 1 }
 0x18a   :  { %605 = vsyncpa [#allocation4], 1 }
 0x18b   :  { %607 = vsyncpa [#allocation4 + $0x1], 1 }

</bundles_post_ra>
